<compile_context>
chip_gen: v7x
topology: tpu7x:2x2x1
jax: 0.10.0
libtpu: 0.0.40
codegen_flags: <defaults>
</compile_context>

<pallas_src>
import jax
import jax.numpy as jnp
from jax.experimental import pallas as pl
from jax.experimental.pallas import tpu as pltpu

K = 9               # SparseConv kernel size
SPARSE_DIM = 32     # SparseConv out channels
EMBED_DIM = 32      # dim (proj is Linear(64,32) => 32 + 32)
NFEAT = K * K + 4   # 85 = [patch(81), t*p, p, t*(1-p), (1-p)]
PACK = 4            # tokens packed per kernel row -> 4*32 = 128 output lanes


def _event_embed_kernel(f_ref, w_ref, o_ref):
    # Single MXU matmul per tile: (tm/4, 4*85) bf16 @ (4*85, 128) bf16 -> f32.
    # Block-diagonal weight => each 128-lane output row holds 4 consecutive tokens,
    # so stores are lane-dense (no masked vst).
    o_ref[...] = jnp.dot(f_ref[...], w_ref[...],
                         preferred_element_type=jnp.float32).astype(o_ref.dtype)


def _build_event_features(x, h, w, dtype):
    """Scatter events into an (h,w) count map (mode='sum'), gather KxK patches.

    The count map is cast to `dtype` *before* the gather so the (B,N,81) patch slab
    never materializes in f32 when dtype=bf16 (counts are exact in bf16 while < 256).
    """
    B, N, _ = x.shape
    xs = jnp.clip(x[..., 0].astype(jnp.int32), 0, w - 1)
    ys = jnp.clip(x[..., 1].astype(jnp.int32), 0, h - 1)
    t = x[..., 2:3].astype(jnp.float32)
    pol = x[..., 3][..., None].astype(jnp.float32)

    b_idx = jnp.broadcast_to(jnp.arange(B)[:, None], (B, N))
    count = jnp.zeros((B, h, w), jnp.float32).at[b_idx, ys, xs].add(1.0)

    pad = K // 2
    padded = jnp.pad(count, ((0, 0), (pad, pad), (pad, pad))).astype(dtype)
    dy, dx = jnp.meshgrid(jnp.arange(K), jnp.arange(K), indexing="ij")
    rows = ys[..., None, None] + dy                    # (B, N, K, K) padded coords
    cols = xs[..., None, None] + dx
    patches = padded[b_idx[..., None, None], rows, cols].reshape(B, N, K * K)
    return patches, t, pol


def _fuse_params(params, dtype):
    """Fold proj(64,32) + both Linear(1,32) + all biases into one (85,32) weight,
    then block-diagonalize it 4x for the lane-dense packed layout."""
    w_sp, b_sp, w_pos, b_pos, w_neg, b_neg, w_proj = params
    wp_sp = w_proj[:, :SPARSE_DIM].T                   # (32, 32) acts on sparse part
    wp_e = w_proj[:, SPARSE_DIM:].T                    # (32, 32) acts on embed part
    b_sp_f = b_sp @ wp_sp                              # (1, 32)
    w_fused = jnp.concatenate([
        w_sp @ wp_sp,                                  # rows 0..80 : patch counts
        w_pos @ wp_e,                                  # row  81    : t * p
        b_pos @ wp_e + b_sp_f,                         # row  82    : p
        w_neg @ wp_e,                                  # row  83    : t * (1-p)
        b_neg @ wp_e + b_sp_f,                         # row  84    : (1-p)
    ], axis=0)                                         # (85, 32)
    # p + (1-p) == 1, so splitting the sparse bias over rows 82/84 is exact.
    w_dense = jnp.kron(jnp.eye(PACK, dtype=w_fused.dtype), w_fused)  # (340, 128)
    return w_dense.astype(dtype)


def event_embed(x, params, h, w, tm=1024):
    """x: (B, N, 4) = [x_coord, y_coord, time, polarity]. Returns (B, N, 32) f32."""
    assert tm % 32 == 0, "tm must be a multiple of 32 (PACK*8 sublane alignment)"
    B, N, _ = x.shape
    M = B * N
    n_tiles = pl.cdiv(M, tm)
    M_pad = n_tiles * tm

    patches, t, pol = _build_event_features(x, h, w, jnp.bfloat16)
    emb_cols = jnp.concatenate([t * pol, pol, t * (1.0 - pol), 1.0 - pol], axis=-1)
    feats = jnp.concatenate(
        [patches, emb_cols.astype(jnp.bfloat16)], axis=-1).reshape(M, NFEAT)
    if M_pad != M:
        feats = jnp.pad(feats, ((0, M_pad - M), (0, 0)))   # zero rows -> zero outputs

    # Pack 4 tokens per row (pure row-major reinterpretation): lane-dense output.
    feats_dense = feats.reshape(M_pad // PACK, PACK * NFEAT)       # (M_pad/4, 340)
    w_dense = _fuse_params(params, jnp.bfloat16)                   # (340, 128)

    rows_per_tile = tm // PACK
    out_dense = pl.pallas_call(
        _event_embed_kernel,
        out_shape=jax.ShapeDtypeStruct((M_pad // PACK, PACK * EMBED_DIM), jnp.float32),
        grid_spec=pltpu.PrefetchScalarGridSpec(
            num_scalar_prefetch=0,
            grid=(n_tiles,),
            in_specs=[
                pl.BlockSpec((rows_per_tile, PACK * NFEAT), lambda i: (i, 0)),
                pl.BlockSpec(w_dense.shape, lambda i: (0, 0)),     # resident weight
            ],
            out_specs=pl.BlockSpec((rows_per_tile, PACK * EMBED_DIM), lambda i: (i, 0)),
        ),
        compiler_params=pltpu.CompilerParams(dimension_semantics=("parallel",)),
    )(feats_dense, w_dense)

    out = out_dense.reshape(M_pad, EMBED_DIM)[:M]
    return out.reshape(B, N, EMBED_DIM)


def reference(x, params, h, w):
    """Plain-JAX f32 reference with the original module's semantics."""
    patches, t, pol = _build_event_features(x, h, w, jnp.float32)
    w_sp, b_sp, w_pos, b_pos, w_neg, b_neg, w_proj = params
    sparse = patches @ w_sp + b_sp
    pos_e = t * w_pos + b_pos
    neg_e = t * w_neg + b_neg
    emb = pol * pos_e + (1.0 - pol) * neg_e
    cat = jnp.concatenate([sparse, emb], axis=-1)
    return cat @ w_proj.T


def init_params(key):
    ks = jax.random.split(key, 7)
    s = 0.05
    w_sp = s * jax.random.normal(ks[0], (K * K, SPARSE_DIM), jnp.float32)
    b_sp = s * jax.random.normal(ks[1], (1, SPARSE_DIM), jnp.float32)
    w_pos = s * jax.random.normal(ks[2], (1, EMBED_DIM), jnp.float32)
    b_pos = s * jax.random.normal(ks[3], (1, EMBED_DIM), jnp.float32)
    w_neg = s * jax.random.normal(ks[4], (1, EMBED_DIM), jnp.float32)
    b_neg = s * jax.random.normal(ks[5], (1, EMBED_DIM), jnp.float32)
    w_proj = s * jax.random.normal(ks[6], (EMBED_DIM, SPARSE_DIM + EMBED_DIM), jnp.float32)
    return (w_sp, b_sp, w_pos, b_pos, w_neg, b_neg, w_proj)


if __name__ == "__main__":
    B, N, H, W = 2, 256, 16, 16

    key = jax.random.PRNGKey(0)
    k_x, k_y, k_t, k_p, k_w = jax.random.split(key, 5)
    xs = jax.random.randint(k_x, (B, N), 0, W).astype(jnp.float32)
    ys = jax.random.randint(k_y, (B, N), 0, H).astype(jnp.float32)
    ts = jax.random.uniform(k_t, (B, N), jnp.float32)
    ps = jax.random.bernoulli(k_p, 0.5, (B, N)).astype(jnp.float32)
    x = jnp.stack([xs, ys, ts, ps], axis=-1)      # (B, N, 4)

    params = init_params(k_w)

    # tm=256 at this small demo size so the grid still has 2 steps (exercises the
    # pipeline / both TCs on v7x); use the default tm=1024 for real workloads.
    out = event_embed(x, params, H, W, tm=256)
    out = jax.block_until_ready(out)

    ref = reference(x, params, H, W)
    assert out.shape == (B, N, EMBED_DIM)
    # Tolerance widened vs f32-exact because features/weights feed the MXU in bf16
    # (counts exact; time/weights carry ~0.2-0.4% relative rounding).
    assert jnp.allclose(out, ref, rtol=1e-2, atol=1e-2), "mismatch vs reference"
    print("KERNEL_OK")
</pallas_src>

<mosaic_0001>
module attributes {stable_mosaic.version = 11 : i64} {
  func.func @_event_embed_kernel(%arg0: i32, %arg1: memref<64x340xbf16, #tpu.memory_space<vmem>>, %arg2: memref<340x128xbf16, #tpu.memory_space<vmem>>, %arg3: memref<64x128xf32, #tpu.memory_space<vmem>>) attributes {dimension_semantics = [#tpu.dimension_semantics<parallel>], iteration_bounds = array<i64: 2>, scalar_prefetch = 0 : i64, scratch_operands = 0 : i64, tpu.core_type = #tpu.core_type<tc>, window_params = [{transform_indices = @transform_0, window_bounds = array<i64: 64, 340>}, {pipeline_mode = #tpu.pipeline_mode<synchronous>, transform_indices = @transform_1, window_bounds = array<i64: 340, 128>}, {transform_indices = @transform_2, window_bounds = array<i64: 64, 128>}]} {
    %c0 = arith.constant 0 : index
    %c0_0 = arith.constant 0 : index
    %0 = vector.load %arg1[%c0, %c0_0] : memref<64x340xbf16, #tpu.memory_space<vmem>>, vector<64x340xbf16>
    %c0_1 = arith.constant 0 : index
    %c0_2 = arith.constant 0 : index
    %1 = vector.load %arg2[%c0_1, %c0_2] : memref<340x128xbf16, #tpu.memory_space<vmem>>, vector<340x128xbf16>
    %cst = arith.constant dense<0.000000e+00> : vector<64x128xf32>
    %2 = tpu.matmul %0, %1, %cst {dimension_numbers = #tpu.dot_dimension_numbers<[1], [0], [0], [1], [0, 0, 1, 1], [], []>} : vector<64x340xbf16>, vector<340x128xbf16>, vector<64x128xf32> -> vector<64x128xf32>
    %c0_3 = arith.constant 0 : index
    %c0_4 = arith.constant 0 : index
    %3 = vector.load %arg3[%c0_3, %c0_4] : memref<64x128xf32, #tpu.memory_space<vmem>>, vector<64x128xf32>
    tpu.vector_store %arg3[%c0_3, %c0_4], %2 {strides = array<i32>} : memref<64x128xf32, #tpu.memory_space<vmem>>, vector<64x128xf32>,
    return
  }
  func.func @transform_0(%arg0: i32) -> (i32, i32) {
    %c0_i32 = arith.constant 0 : i32
    %c0_i32_0 = arith.constant 0 : i32
    return %arg0, %c0_i32 : i32, i32
  }
  func.func @transform_1(%arg0: i32) -> (i32, i32) {
    %c0_i32 = arith.constant 0 : i32
    %c0_i32_0 = arith.constant 0 : i32
    %c0_i32_1 = arith.constant 0 : i32
    return %c0_i32, %c0_i32_0 : i32, i32
  }
  func.func @transform_2(%arg0: i32) -> (i32, i32) {
    %c0_i32 = arith.constant 0 : i32
    %c0_i32_0 = arith.constant 0 : i32
    return %arg0, %c0_i32 : i32, i32
  }
}

</mosaic_0001>

<bundles_post_ra>
// kernel: tpu_custom_call.1
= control target key start
LH: loop header
LB: loop body
LE: loop exit
PB: predicated region body
PF: predicated region fallthrough
CT: control target
= control target key end

     0   :  { %7 = vsyncpa [#allocation3], 0  ;;  %s1113_s0 = inlined_call_operand.vmem [shape: bf16[128,340], index: 0, kind: input, shape index: {}]   ;;  %s1114_s1 = inlined_call_operand.vmem [shape: bf16[340,128], index: 1, kind: input, shape index: {}]   ;;  %s1115_s2 = inlined_call_operand.hbm [shape: f32[128,128], index: 2, kind: output, shape index: {}]  }
   0x1   :  { %9 = vsyncpa [#allocation3 + $0x1], 0  ;;  %s912_s9 = smov 0   ;;  %s914_s10 = smov 0  }
   0x2   :  { %s916_s11 = smov 0   ;;  %s918_s12 = smov 0  }
   0x3 LB: > { %s933_s13 = sadd.s32 4294967295, %s892_s12   ;;  %s628_s14 = sadd.s32 4294967294, %s892_s12   ;;  %s892_s12 = sphi %s918_s12, %s1121_s12   ;;  %s888_s11 = sphi %s916_s11, %s1120_s11   ;;  %s884_s10 = sphi %s914_s10, %s1119_s10   ;;  %s880_s9 = sphi %s912_s9, %s1118_s9  }
   0x4   : > { %s937_s15 = sadd.s32 1, %s892_s12   ;;  %s69_s16 = sadd.s32 1, %s888_s11 }
   0x5   : > { %s66_s17 = ssub.s32 %s892_s12, %s937_s15  ;;  %p79_p0 = scmp.ne.s32.totalorder %s888_s11, %s884_s10 }
   0x6   : > { %p67_p1 = scmp.eq.s32.totalorder %s66_s17, 0  ;;  %p80_p2 = scmp.eq.s32.totalorder %s933_s13, 1 }
   0x7   : > { %p85_p3 = scmp.ne.s32.totalorder %s884_s10, %s880_s9  ;;  %p86_p4 = scmp.eq.s32.totalorder %s628_s14, 1 }
   0x8   : > { %s948_s18 = scalar_select %p67_p1, %s888_s11, %s69_s16  }
   0x9   : > { %p950_p5 = por %p80_p2, %p79_p0  ;;  %p954_p6 = por %p86_p4, %p85_p3 }
   0xa   : > { %p631_p7 = scmp.ge.s32.totalorder %s892_s12, 1  ;;  %p117_p8 = scmp.lt.s32.totalorder %s892_s12, 3 }
   0xc   : > { %p118_p9 = pnand %p631_p7, %p117_p8 }
   0xd   : > { %v792_v0 = vld [vmem:[%s1114_s1 + $0x40] sm:$0xff] (!%p118_p9)   ;;  %v794_v2 = vld [vmem:[%s1114_s1 + $0x48] sm:$0xff] (!%p118_p9)   ;;  %v796_v4 = vld [vmem:[%s1114_s1 + $0x50] sm:$0xff] (!%p118_p9)   ;;  %s633_s3 = sshll.u32 (!%p118_p9), %s933_s13, 3  ;;  %vm410_vm0 = vcmask (!%p118_p9), 1041408   ;;  %vm397_vm1 = vcmask (!%p118_p9), 687104  }
   0xe   : > { %121 = sbr.rel (%p118_p9) target bundleno = 304 (0x130), region = 28  ;;  %v793_v1 = vld [vmem:[%s1114_s1] sm:$0xff] (!%p118_p9)   ;;  %679 = vmatprep.subr.bf16.mxu0 (!%p118_p9), %v792_v0  ;;  %v795_v3 = vld [vmem:[%s1114_s1 + $0x8] sm:$0xff] (!%p118_p9)   ;;  %v797_v6 = vld [vmem:[%s1114_s1 + $0x10] sm:$0xff] (!%p118_p9)   ;;  %p141_p10 = scmp.lt.s32.totalorder (!%p118_p9), %s633_s3, 15 }
   0xf   : > { %680 = vmatpush3.bf16.msra.mxu0 (!%p118_p9), %v793_v1  ;;  %v798_v5 = vld [vmem:[%s1114_s1 + $0x80] sm:$0xff] (!%p118_p9)   ;;  %v799_v7 = vld [vmem:[%s1114_s1 + $0x58] sm:$0xff] (!%p118_p9)   ;;  %v801_v8 = vld [vmem:[%s1114_s1 + $0x88] sm:$0xff] (!%p118_p9)   ;;  %s137_s5 = sand.u32 (!%p118_p9), 1, %s884_s10   ;;  %s678_s8 = sshll.u32 (!%p118_p9), %s933_s13, 10 }
  0x10   : > { %681 = vmatprep.subr.bf16.mxu0 (!%p118_p9), %v794_v2  ;;  %729 = vmatprep.subr.bf16.mxu1 (!%p118_p9), %v798_v5  ;;  %v800_v9 = vld [vmem:[%s1114_s1 + $0x18] sm:$0xff] (!%p118_p9)   ;;  %v802_v10 = vld [vmem:[%s1114_s1 + $0x60] sm:$0xff] (!%p118_p9)   ;;  %v804_v11 = vld [vmem:[%s1114_s1 + $0x90] sm:$0xff] (!%p118_p9)   ;;  %s632_s6 = sshll.u32 (!%p118_p9), %s137_s5, 6  ;;  %s1064_s21 = scalar_lea.hbm (!%p118_p9), %s1115_s2, %s678_s8 }
  0x11   : > { %730 = vmatpush3.bf16.msra.mxu1 (!%p118_p9), %v798_v5  ;;  %v803_v12 = vld [vmem:[%s1114_s1 + $0x20] sm:$0xff] (!%p118_p9)   ;;  %v807_v13 = vld [vmem:[%s1114_s1 + $0x98] sm:$0xff] (!%p118_p9)   ;;  %v805_v14 = vld [vmem:[%s1114_s1 + $0x68] sm:$0xff] (!%p118_p9)   ;;  %s1051_s7 = scalar_lea.vmem (!%p118_p9), [#allocation2], %s632_s6  ;;  %s894_s22 = smov (!%p118_p9), [#allocation2]  }
  0x12   : > { %731 = vmatprep.subr.bf16.mxu1 (!%p118_p9), %v801_v8  ;;  %v810_v15 = vld [vmem:[%s1114_s1 + $0xa0] sm:$0xff] (!%p118_p9)   ;;  %v806_v16 = vld [vmem:[%s1114_s1 + $0x28] sm:$0xff] (!%p118_p9)   ;;  %v808_v17 = vld [vmem:[%s1114_s1 + $0x70] sm:$0xff] (!%p118_p9)   ;;  %s566_s14 = sshll.u32 (!%p118_p9), %s1051_s7, 4  ;;  %s834_s23 = sshll.u32 (!%p118_p9), %s894_s22, 4  ;;  %s1066_s14 = int_to_ptr.vmem [resolvable:$true] %s566_s14  ;;  %s835_s23 = int_to_ptr.vmem [resolvable:$false] %s834_s23 }
  0x13   : > { %682 = vmatpush3.bf16.msra.mxu0 (!%p118_p9), %v795_v3  ;;  %v809_v18 = vld [vmem:[%s1114_s1 + $0x30] sm:$0xff] (!%p118_p9)   ;;  %v811_v19 = vld [vmem:[%s1114_s1 + $0x78] sm:$0xff] (!%p118_p9)   ;;  %v813_v20 = vld [vmem:[%s1114_s1 + $0xa8] ss:$0 sps:$4 sm:$0x33] (!%p118_p9)   ;;  %s830_s13 = scalar_lea.vmem (!%p118_p9), %s1066_s14, 1024  ;;  %p837_p0 = scmp.lt.s32.totalorder (!%p118_p9), %s1066_s14, %s835_s23 }
  0x14   : > { %683 = vmatprep.subr.bf16.mxu0 (!%p118_p9), %v796_v4  ;;  %v412_v23 = vsel (!%p118_p9), %vm410_vm0, %v813_v20, 0  ;;  %v812_v24 = vld [vmem:[%s1114_s1 + $0x38] sm:$0xff] (!%p118_p9)   ;;  %p831_p11 = scmp.ne.s32.totalorder (!%p118_p9), %s1066_s14, %s830_s13  ;;  %s836_s24 = scalar_lea.vmem (!%p118_p9), %s835_s23, 2048 }
  0x15   : > { %s1123_s3 = smov (!%p141_p10, %s633_s3), 15  ;;  %732 = vmatpush3.bf16.msra.mxu1 %v801_v8  ;;  %p838_p1 = scmp.lt.s32.totalorder %s836_s24, %s830_s13 }
  0x16   : > { %733 = vmatprep.subr.bf16.mxu1 %v804_v11  ;;  %s750_s4 = smul.u32 12, %s1123_s3  ;;  %p832_p12 = pnand %p831_p11, %p950_p5 }
  0x17   : > { %684 = vmatpush3.bf16.msra.mxu0 %v797_v6  ;;  %p839_p2 = por %p838_p1, %p837_p0 }
  0x18   : > { %685 = vmatprep.subr.bf16.mxu0 %v799_v7  ;;  %s1015_s3 = scalar_lea.vmem %s1113_s0, %s750_s4  ;;  %p833_p13 = pneg %p832_p12 }
  0x19   : > { %734 = vmatpush3.bf16.msra.mxu1 %v804_v11  ;;  %v816_v21 = vld [vmem:[%s1015_s3 + $0x4] ss:$12 sps:$4 sm:$0xff]   ;;  %v817_v22 = vld [vmem:[%s1015_s3 + $0x8] ss:$12 sps:$4 sm:$0xff]   ;;  %v818_v25 = vld [vmem:[%s1015_s3 + $0x20] ss:$12 sps:$4 sm:$0xff]  }
  0x1a   : > { %735 = vmatprep.subr.bf16.mxu1 %v807_v13  ;;  %446 = vmatprep.mubr.bf16.mxu0 %v816_v21  ;;  %v825_v26 = vld [vmem:[%s1015_s3 + $0x38] ss:$12 sps:$4 sm:$0xff]   ;;  %v814_v27 = vld [vmem:[%s1015_s3] ss:$12 sps:$4 sm:$0xff]   ;;  %v819_v28 = vld [vmem:[%s1015_s3 + $0x1c] ss:$12 sps:$4 sm:$0xff]   ;;  %p840_p3 = pnand %p839_p2, %p833_p13 }
  0x1b   : > { %686 = vmatpush3.bf16.msra.mxu0 %v800_v9  ;;  %741 = vmatprep.mubr.msk.bf16.mxu1 %vm397_vm1, %v817_v22  ;;  %v826_v29 = vld [vmem:[%s1015_s3 + $0x50] ss:$12 sps:$4 sm:$0xff]   ;;  %v821_v30 = vld [vmem:[%s1015_s3 + $0x18] ss:$12 sps:$4 sm:$0xff]   ;;  %v822_v31 = vld [vmem:[%s1015_s3 + $0x34] ss:$12 sps:$4 sm:$0xff]  }
  0x1c   : > { %687 = vmatprep.subr.bf16.mxu0 %v802_v10  ;;  %v824_v32 = vld [vmem:[%s1015_s3 + $0x30] ss:$12 sps:$4 sm:$0xff]   ;;  %v827_v33 = vld [vmem:[%s1015_s3 + $0x4c] ss:$12 sps:$4 sm:$0xff]   ;;  %v829_v34 = vld [vmem:[%s1015_s3 + $0x48] ss:$12 sps:$4 sm:$0xff]  }
  0x1d   : > { %736 = vmatpush3.bf16.msra.mxu1 %v807_v13  ;;  %s1072_s3 = scalar_lea.sflag [#allocation3], %s137_s5 }
  0x1e   : > { %737 = vmatprep.subr.bf16.mxu1 %v810_v15 }
  0x1f   : > { %688 = vmatpush3.bf16.msra.mxu0 %v803_v12 }
  0x20   : > { %689 = vmatprep.subr.bf16.mxu0 %v805_v14 }
  0x21   : > { %738 = vmatpush3.bf16.msra.mxu1 %v810_v15 }
  0x22   : > { %749 = vmatprep.subr.msk.bf16.mxu1 %vm410_vm0, %v813_v20 }
  0x23   : > { %690 = vmatpush3.bf16.msra.mxu0 %v806_v16 }
  0x24   : > { %691 = vmatprep.subr.bf16.mxu0 %v808_v17 }
  0x25   : > { %740 = vmatpush3.bf16.msra.mxu1 %v412_v23 }
  0x27   : > { %692 = vmatpush3.bf16.msra.mxu0 %v809_v18 }
  0x28   : > { %693 = vmatprep.subr.bf16.mxu0 %v811_v19  ;;  %742 = vmatmul.mubr.msk.bf16.vlgmr.msra.gmra.mrb[0].mxu1 %vm397_vm1, %v818_v25 }
  0x29   : > { %745 = vmatprep.mubr.msk.bf16.mxu1 %vm397_vm1, %v825_v26 }
  0x2b   : > { %694 = vmatpush3.bf16.msra.mxu0 %v812_v24 }
  0x2e   : > { %447 = vmatmul.mubr.bf16.vlgmr.msra.gmra.mrb[0].mxu0 %v814_v27 }
  0x2f   : > { %454 = vmatprep.mubr.bf16.mxu0 %v819_v28 }
  0x30   : > { %746 = vmatmul.mubr.msk.bf16.gmra.mrb[4].mxu1 %vm397_vm1, %v826_v29 }
  0x36   : > { %455 = vmatmul.mubr.bf16.gmra.mrb[4].mxu0 %v821_v30 }
  0x37   : > { %462 = vmatprep.mubr.bf16.mxu0 %v822_v31 }
  0x3e   : > { %463 = vmatmul.mubr.bf16.gmra.mrb[8].mxu0 %v824_v32 }
  0x3f   : > { %470 = vmatprep.mubr.bf16.mxu0 %v827_v33 }
  0x46   : > { %471 = vmatmul.mubr.bf16.gmra.mrb[12].mxu0 %v829_v34 }
  0xfb   : > { %v743_v35 = vpop.f32.mrb[0].mxu1 }
  0xfc   : > { %v513_v36 = vpop.f32.mrb[1].mxu1 }
  0xfd   : > { %v744_v38 = vpop.f32.mrb[2].mxu1 }
  0xfe   : > { %v516_v40 = vpop.f32.mrb[3].mxu1 }
 0x101   : > { %v695_v37 = vpop.f32.mrb[0].mxu0 }
 0x102   : > { %v696_v39 = vpop.f32.mrb[1].mxu0 }
 0x103   : > { %v697_v41 = vadd.f32 %v696_v39, %v695_v37  ;;  %v698_v42 = vpop.f32.mrb[2].mxu0  ;;  %v747_v47 = vpop.f32.mrb[4].mxu1 }
 0x104   : > { %v699_v43 = vpop.f32.mrb[3].mxu0  ;;  %v529_v48 = vpop.f32.mrb[5].mxu1 }
 0x105   : > { %v700_v44 = vadd.f32 %v699_v43, %v698_v42  ;;  %v514_v45 = vadd.f32 %v697_v41, %v513_v36  ;;  %v748_v50 = vpop.f32.mrb[6].mxu1 }
 0x106   : > { %v532_v52 = vpop.f32.mrb[7].mxu1 }
 0x107   : > { %544 = vst [vmem:[%s1051_s7] sm:$0xff] %v514_v45  ;;  %v517_v46 = vadd.f32 %v700_v44, %v516_v40 }
 0x109   : > { %545 = vst [vmem:[%s1051_s7 + $0x8] sm:$0xff] %v517_v46  ;;  %v701_v49 = vpop.f32.mrb[4].mxu0 }
 0x10a   : > { %v702_v51 = vpop.f32.mrb[5].mxu0 }
 0x10b   : > { %v703_v53 = vadd.f32 %v702_v51, %v701_v49  ;;  %v704_v54 = vpop.f32.mrb[6].mxu0 }
 0x10c   : > { %v705_v55 = vpop.f32.mrb[7].mxu0 }
 0x10d   : > { %v522_v56 = vadd.f32 %v743_v35, %v703_v53  ;;  %v706_v57 = vadd.f32 %v705_v55, %v704_v54 }
 0x10f   : > { %546 = vst [vmem:[%s1051_s7 + $0x10] sm:$0xff] %v522_v56  ;;  %v525_v58 = vadd.f32 %v744_v38, %v706_v57 }
 0x111   : > { %547 = vst [vmem:[%s1051_s7 + $0x18] sm:$0xff] %v525_v58  ;;  %v707_v59 = vpop.f32.mrb[8].mxu0 }
 0x112   : > { %v708_v60 = vpop.f32.mrb[9].mxu0 }
 0x113   : > { %v709_v61 = vadd.f32 %v708_v60, %v707_v59  ;;  %v710_v62 = vpop.f32.mrb[10].mxu0 }
 0x114   : > { %v711_v63 = vpop.f32.mrb[11].mxu0 }
 0x115   : > { %v712_v0 = vadd.f32 %v711_v63, %v710_v62  ;;  %v530_v1 = vadd.f32 %v709_v61, %v529_v48 }
 0x117   : > { %548 = vst [vmem:[%s1051_s7 + $0x20] sm:$0xff] %v530_v1  ;;  %v533_v2 = vadd.f32 %v712_v0, %v532_v52 }
 0x119   : > { %549 = vst [vmem:[%s1051_s7 + $0x28] sm:$0xff] %v533_v2  ;;  %v713_v3 = vpop.f32.mrb[12].mxu0 }
 0x11a   : > { %v714_v4 = vpop.f32.mrb[13].mxu0 }
 0x11b   : > { %v715_v5 = vadd.f32 %v714_v4, %v713_v3  ;;  %v716_v6 = vpop.f32.mrb[14].mxu0 }
 0x11c   : > { %v717_v7 = vpop.f32.mrb[15].mxu0 }
 0x11d   : > { %v538_v8 = vadd.f32 %v747_v47, %v715_v5  ;;  %v718_v9 = vadd.f32 %v717_v7, %v716_v6 }
 0x11f   : > { %550 = vst [vmem:[%s1051_s7 + $0x30] sm:$0xff] %v538_v8  ;;  %v541_v10 = vadd.f32 %v748_v50, %v718_v9 }
 0x121   : > { %551 = vst [vmem:[%s1051_s7 + $0x38] sm:$0xff] %v541_v10 }
 0x122   : > { %843 = shalt.err (!%p840_p3)
}
 0x123   : > { %s844_s25 = scalar_lea.hbm %s1064_s21, 1024  ;;  %s848_s28 = scalar_lea.hbm %s1115_s2, 2048 }
 0x124   : > { %p845_p4 = scmp.ne.s32.totalorder %s1064_s21, %s844_s25  ;;  %p849_p9 = scmp.lt.u32.totalorder %s1064_s21, %s1115_s2 }
 0x125   : > { %p850_p10 = scmp.lt.u32.totalorder %s848_s28, %s844_s25  ;;  %p852_p12 = scmp.lt.u32.totalorder %s844_s25, %s1064_s21 }
 0x126   : > { %p846_p7 = pnand %p845_p4, %p950_p5 }
 0x127   : > { %p851_p11 = por %p850_p10, %p849_p9 }
 0x128   : > { %p847_p8 = pneg %p846_p7 }
 0x129   : > { %p853_p13 = por %p852_p12, %p851_p11 }
 0x12b   : > { %p854_p0 = pnand %p853_p13, %p847_p8 }
 0x12d   : > { %857 = shalt.err (!%p854_p0)
}
 0x12e   : > { %s895_s4 = smov 128   ;;  %s896_s5 = smov 8  }
 0x12f   : > { %751 = dma.vmem_to_hbm [thread:$0]  (%p950_p5), %s1066_s14, 1024, %s1064_s21, %s1072_s3, %s895_s4, %s895_s4, %s896_s5  }
 0x130 PF: > { %p757_p1 = scmp.ge.s32.totalorder %s892_s12, 2  ;;  %s581_s6 = sand.u32 1, %s880_s9  }
 0x131   : > { %s582_s7 = scalar_lea.sflag [#allocation3], %s581_s6 }
 0x132   : > { %p754_p2 = pnand %p757_p1, %p954_p6 }
 0x134   : > { %875 = dma.done.wait (!%p754_p2), %s582_s7, 1024  }
 0x135   : > { %877 = vsyncadd (!%p754_p2), %s582_s7, 4294966272  ;;  %p12_p3 = scmp.ge.s32.totalorder %s937_s15, 4   ;;  %s1118_s9 = smov %s884_s10 }
 0x136   : > { %s1119_s10 = smov %s888_s11  ;;  %s1120_s11 = smov %s948_s18 }
 0x137   : > { %s1121_s12 = smov %s937_s15  ;;  %14 = sbr.rel (!%p12_p3) target bundleno = 3 (0x3), region = 63 }
 0x13e   :  { %587 = vsyncpa [#allocation3], 1 }
 0x13f   :  { %589 = vsyncpa [#allocation3 + $0x1], 1 }

</bundles_post_ra>
